<compile_context>
chip_gen: v5e
topology: v5e:2x2
jax: 0.10.0
libtpu: 0.0.40
codegen_flags: <defaults>
</compile_context>

<pallas_src>
import jax
import jax.numpy as jnp
from jax.experimental import pallas as pl
from jax.experimental.pallas import tpu as pltpu


def autoencoder_kernel(x_ref, w1_ref, b1_ref, w23_ref, b23_ref,
                       w4_ref, b4_ref, out_ref):
    """Fused encoder+decoder forward for one (TB, D) batch tile.

    f32 input is cast to bf16 in-kernel; matmuls run on the MXU with f32
    accumulation; bias add / ReLU / sigmoid stay in f32.
    """
    x = x_ref[...].astype(jnp.bfloat16)                          # (TB, D)

    # encoder layer 1: (TB, D) @ (D, H) -> (TB, H), bias+ReLU in f32
    h1 = jnp.dot(x, w1_ref[...], preferred_element_type=jnp.float32)
    h1 = jnp.maximum(h1 + b1_ref[...], 0.0)

    # fused encoder-2 + decoder-1 (no nonlinearity between them):
    #   z = h1@w2 + b2 ; h2_pre = z@w3 + b3  ==  h1@(w2@w3) + (b2@w3 + b3)
    h2 = jnp.dot(h1.astype(jnp.bfloat16), w23_ref[...],
                 preferred_element_type=jnp.float32)
    h2 = jnp.maximum(h2 + b23_ref[...], 0.0)

    # decoder layer 2 + sigmoid reconstruction
    y = jnp.dot(h2.astype(jnp.bfloat16), w4_ref[...],
                preferred_element_type=jnp.float32) + b4_ref[...]
    out_ref[...] = jax.nn.sigmoid(y).astype(out_ref.dtype)


def _round_up(x, m):
    return ((x + m - 1) // m) * m


_MAX_TB = 1024  # rows per batch tile (sublane multiple, well within VMEM)


def _choose_batch_tile(B):
    """Large tiles to amortize per-grid-step overhead; keep grid >= 2 when the
    batch allows so v7x's two TensorCores both get work."""
    if B > 2 * _MAX_TB:
        return _MAX_TB
    tb = _round_up(pl.cdiv(B, 2), 8)
    return max(8, min(tb, _MAX_TB))


def prepare_params(params):
    """One-time parameter preprocessing (call once, reuse across forwards)."""
    (w1, b1, w2, b2, w3, b3, w4, b4) = params
    w23 = (w2 @ w3).astype(jnp.bfloat16)             # (HID, HID) fused weight
    b23 = (b2 @ w3 + b3).astype(jnp.float32)         # (1, HID) fused bias
    return (w1.astype(jnp.bfloat16), b1.astype(jnp.float32),
            w23, b23,
            w4.astype(jnp.bfloat16), b4.astype(jnp.float32))


def autoencoder_forward(x_nchw, prepared, out_dtype=jnp.float32):
    """x_nchw: (B, C, H, W) float32 -> reconstructed (B, C, H, W) out_dtype."""
    B, C, H, W = x_nchw.shape
    D = C * H * W
    w1b, b1f, w23, b23, w4b, b4f = prepared

    # reshape only — no cast, no pad (both would be extra HBM passes)
    x_flat = x_nchw.reshape(B, D)

    TB = _choose_batch_tile(B)
    grid = (pl.cdiv(B, TB),)

    def resident(arr):
        # Full-extent block with a constant index map: DMA'd once, stays in
        # VMEM across all batch-tile grid steps.
        return pl.BlockSpec(arr.shape, lambda i, _nd=arr.ndim: (0,) * _nd)

    out_flat = pl.pallas_call(
        autoencoder_kernel,
        out_shape=jax.ShapeDtypeStruct((B, D), out_dtype),
        grid=grid,
        in_specs=[
            pl.BlockSpec((TB, D), lambda i: (i, 0)),   # x batch tile
            resident(w1b), resident(b1f),
            resident(w23), resident(b23),
            resident(w4b), resident(b4f),
        ],
        out_specs=pl.BlockSpec((TB, D), lambda i: (i, 0)),
        compiler_params=pltpu.CompilerParams(
            dimension_semantics=("parallel",)),
    )(x_flat, w1b, b1f, w23, b23, w4b, b4f)

    return out_flat.reshape(B, C, H, W)


def init_params(key, d_in, d_hidden, d_latent):
    """Deterministic PyTorch-Linear-style uniform init, stored as (in, out)."""
    ks = jax.random.split(key, 8)

    def linear(kw, kb, fan_in, fan_out):
        bound = 1.0 / jnp.sqrt(jnp.float32(fan_in))
        w = jax.random.uniform(kw, (fan_in, fan_out), jnp.float32, -bound, bound)
        b = jax.random.uniform(kb, (1, fan_out), jnp.float32, -bound, bound)
        return w, b

    w1, b1 = linear(ks[0], ks[1], d_in, d_hidden)      # encoder layer 1
    w2, b2 = linear(ks[2], ks[3], d_hidden, d_latent)  # encoder layer 2
    w3, b3 = linear(ks[4], ks[5], d_latent, d_hidden)  # decoder layer 1
    w4, b4 = linear(ks[6], ks[7], d_hidden, d_in)      # decoder layer 2
    return (w1, b1, w2, b2, w3, b3, w4, b4)


def reference_forward_f32(x_nchw, params):
    """Original unfused f32 forward (PyTorch semantics)."""
    B, C, H, W = x_nchw.shape
    x = x_nchw.reshape(B, C * H * W)
    (w1, b1, w2, b2, w3, b3, w4, b4) = params
    h1 = jnp.maximum(x @ w1 + b1, 0.0)
    z = h1 @ w2 + b2
    h2 = jnp.maximum(z @ w3 + b3, 0.0)
    y = jax.nn.sigmoid(h2 @ w4 + b4)
    return y.reshape(B, C, H, W)


def reference_forward_bf16_fused(x_nchw, params):
    """Pure-JAX mirror of the kernel numerics (bf16 inputs, f32 acc, fusion)."""
    B, C, H, W = x_nchw.shape
    (w1, b1, w2, b2, w3, b3, w4, b4) = params
    w23 = (w2 @ w3).astype(jnp.bfloat16)
    b23 = b2 @ w3 + b3
    x = x_nchw.reshape(B, C * H * W).astype(jnp.bfloat16)
    h1 = jnp.maximum(jnp.dot(x, w1.astype(jnp.bfloat16),
                             preferred_element_type=jnp.float32) + b1, 0.0)
    h2 = jnp.maximum(jnp.dot(h1.astype(jnp.bfloat16), w23,
                             preferred_element_type=jnp.float32) + b23, 0.0)
    y = jnp.dot(h2.astype(jnp.bfloat16), w4.astype(jnp.bfloat16),
                preferred_element_type=jnp.float32) + b4
    return jax.nn.sigmoid(y).reshape(B, C, H, W)


if __name__ == "__main__":
    # Small shapes consistent with example_input_array = zeros(2, C, W, H)
    B, C, H, W = 2, 1, 16, 16
    D = C * H * W          # 256
    HIDDEN = 128
    LATENT = 32

    key = jax.random.PRNGKey(0)
    k_x, k_p = jax.random.split(key)
    x = jax.random.normal(k_x, (B, C, H, W), dtype=jnp.float32)
    params = init_params(k_p, D, HIDDEN, LATENT)
    prepared = prepare_params(params)   # one-time preprocessing

    x_hat = autoencoder_forward(x, prepared)
    x_hat = jax.block_until_ready(x_hat)
    assert x_hat.shape == x.shape
    assert x_hat.dtype == jnp.float32

    # Tight check vs a pure-JAX reference with identical (bf16, fused) numerics
    ref_bf16 = reference_forward_bf16_fused(x, params)
    assert jnp.allclose(x_hat, ref_bf16, atol=2e-3, rtol=2e-3), \
        "kernel mismatch vs bf16 fused reference"

    # Loose check vs the original unfused f32 forward (dtype + fusion drift)
    ref_f32 = reference_forward_f32(x, params)
    assert jnp.allclose(x_hat, ref_f32, atol=3e-2, rtol=3e-2), \
        "semantics drift vs f32 reference"

    print("KERNEL_OK")
</pallas_src>

<mosaic_0001>
module attributes {stable_mosaic.version = 11 : i64} {
  func.func @autoencoder_kernel(%arg0: i32, %arg1: memref<8x256xf32, #tpu.memory_space<vmem>>, %arg2: memref<256x128xbf16, #tpu.memory_space<vmem>>, %arg3: memref<1x128xf32, #tpu.memory_space<vmem>>, %arg4: memref<128x128xbf16, #tpu.memory_space<vmem>>, %arg5: memref<1x128xf32, #tpu.memory_space<vmem>>, %arg6: memref<128x256xbf16, #tpu.memory_space<vmem>>, %arg7: memref<1x256xf32, #tpu.memory_space<vmem>>, %arg8: memref<8x256xf32, #tpu.memory_space<vmem>>) attributes {dimension_semantics = [#tpu.dimension_semantics<parallel>], iteration_bounds = array<i64: 1>, scalar_prefetch = 0 : i64, scratch_operands = 0 : i64, tpu.core_type = #tpu.core_type<tc>, window_params = [{transform_indices = @transform_0, window_bounds = array<i64: 8, 256>}, {pipeline_mode = #tpu.pipeline_mode<synchronous>, transform_indices = @transform_1, window_bounds = array<i64: 256, 128>}, {pipeline_mode = #tpu.pipeline_mode<synchronous>, transform_indices = @transform_2, window_bounds = array<i64: 1, 128>}, {pipeline_mode = #tpu.pipeline_mode<synchronous>, transform_indices = @transform_3, window_bounds = array<i64: 128, 128>}, {pipeline_mode = #tpu.pipeline_mode<synchronous>, transform_indices = @transform_4, window_bounds = array<i64: 1, 128>}, {pipeline_mode = #tpu.pipeline_mode<synchronous>, transform_indices = @transform_5, window_bounds = array<i64: 128, 256>}, {pipeline_mode = #tpu.pipeline_mode<synchronous>, transform_indices = @transform_6, window_bounds = array<i64: 1, 256>}, {transform_indices = @transform_7, window_bounds = array<i64: 8, 256>}]} {
    %c0 = arith.constant 0 : index
    %c0_0 = arith.constant 0 : index
    %0 = vector.load %arg1[%c0, %c0_0] : memref<8x256xf32, #tpu.memory_space<vmem>>, vector<8x256xf32>
    %1 = arith.truncf %0 : vector<8x256xf32> to vector<8x256xbf16>
    %c0_1 = arith.constant 0 : index
    %c0_2 = arith.constant 0 : index
    %2 = vector.load %arg2[%c0_1, %c0_2] : memref<256x128xbf16, #tpu.memory_space<vmem>>, vector<256x128xbf16>
    %cst = arith.constant dense<0.000000e+00> : vector<8x128xf32>
    %3 = tpu.matmul %1, %2, %cst {dimension_numbers = #tpu.dot_dimension_numbers<[1], [0], [0], [1], [0, 0, 1, 1], [], []>} : vector<8x256xbf16>, vector<256x128xbf16>, vector<8x128xf32> -> vector<8x128xf32>
    %c0_3 = arith.constant 0 : index
    %c0_4 = arith.constant 0 : index
    %4 = vector.load %arg3[%c0_3, %c0_4] : memref<1x128xf32, #tpu.memory_space<vmem>>, vector<1x128xf32>
    %5 = vector.broadcast %4 : vector<1x128xf32> to vector<8x128xf32>
    %6 = arith.addf %3, %5 : vector<8x128xf32>
    %cst_5 = arith.constant 0.000000e+00 : f32
    %7 = vector.broadcast %cst_5 : f32 to vector<8x128xf32>
    %8 = arith.maximumf %6, %7 : vector<8x128xf32>
    %9 = arith.truncf %8 : vector<8x128xf32> to vector<8x128xbf16>
    %c0_6 = arith.constant 0 : index
    %c0_7 = arith.constant 0 : index
    %10 = vector.load %arg4[%c0_6, %c0_7] : memref<128x128xbf16, #tpu.memory_space<vmem>>, vector<128x128xbf16>
    %cst_8 = arith.constant dense<0.000000e+00> : vector<8x128xf32>
    %11 = tpu.matmul %9, %10, %cst_8 {dimension_numbers = #tpu.dot_dimension_numbers<[1], [0], [0], [1], [0, 0, 1, 1], [], []>} : vector<8x128xbf16>, vector<128x128xbf16>, vector<8x128xf32> -> vector<8x128xf32>
    %c0_9 = arith.constant 0 : index
    %c0_10 = arith.constant 0 : index
    %12 = vector.load %arg5[%c0_9, %c0_10] : memref<1x128xf32, #tpu.memory_space<vmem>>, vector<1x128xf32>
    %13 = vector.broadcast %12 : vector<1x128xf32> to vector<8x128xf32>
    %14 = arith.addf %11, %13 : vector<8x128xf32>
    %cst_11 = arith.constant 0.000000e+00 : f32
    %15 = vector.broadcast %cst_11 : f32 to vector<8x128xf32>
    %16 = arith.maximumf %14, %15 : vector<8x128xf32>
    %17 = arith.truncf %16 : vector<8x128xf32> to vector<8x128xbf16>
    %c0_12 = arith.constant 0 : index
    %c0_13 = arith.constant 0 : index
    %18 = vector.load %arg6[%c0_12, %c0_13] : memref<128x256xbf16, #tpu.memory_space<vmem>>, vector<128x256xbf16>
    %cst_14 = arith.constant dense<0.000000e+00> : vector<8x256xf32>
    %19 = tpu.matmul %17, %18, %cst_14 {dimension_numbers = #tpu.dot_dimension_numbers<[1], [0], [0], [1], [0, 0, 1, 1], [], []>} : vector<8x128xbf16>, vector<128x256xbf16>, vector<8x256xf32> -> vector<8x256xf32>
    %c0_15 = arith.constant 0 : index
    %c0_16 = arith.constant 0 : index
    %20 = vector.load %arg7[%c0_15, %c0_16] : memref<1x256xf32, #tpu.memory_space<vmem>>, vector<1x256xf32>
    %21 = vector.broadcast %20 : vector<1x256xf32> to vector<8x256xf32>
    %22 = arith.addf %19, %21 : vector<8x256xf32>
    %23 = arith.negf %22 : vector<8x256xf32>
    %24 = math.exp %23 : vector<8x256xf32>
    %cst_17 = arith.constant 1.000000e+00 : f32
    %25 = vector.broadcast %cst_17 : f32 to vector<8x256xf32>
    %26 = arith.addf %25, %24 : vector<8x256xf32>
    %27 = arith.divf %25, %26 : vector<8x256xf32>
    %c0_18 = arith.constant 0 : index
    %c0_19 = arith.constant 0 : index
    %28 = vector.load %arg8[%c0_18, %c0_19] : memref<8x256xf32, #tpu.memory_space<vmem>>, vector<8x256xf32>
    tpu.vector_store %arg8[%c0_18, %c0_19], %27 {strides = array<i32>} : memref<8x256xf32, #tpu.memory_space<vmem>>, vector<8x256xf32>,
    return
  }
  func.func @transform_0(%arg0: i32) -> (i32, i32) {
    %c0_i32 = arith.constant 0 : i32
    %c0_i32_0 = arith.constant 0 : i32
    return %arg0, %c0_i32 : i32, i32
  }
  func.func @transform_1(%arg0: i32) -> (i32, i32) {
    %c0_i32 = arith.constant 0 : i32
    %c0_i32_0 = arith.constant 0 : i32
    %c0_i32_1 = arith.constant 0 : i32
    return %c0_i32, %c0_i32_0 : i32, i32
  }
  func.func @transform_2(%arg0: i32) -> (i32, i32) {
    %c0_i32 = arith.constant 0 : i32
    %c0_i32_0 = arith.constant 0 : i32
    %c0_i32_1 = arith.constant 0 : i32
    return %c0_i32, %c0_i32_0 : i32, i32
  }
  func.func @transform_3(%arg0: i32) -> (i32, i32) {
    %c0_i32 = arith.constant 0 : i32
    %c0_i32_0 = arith.constant 0 : i32
    %c0_i32_1 = arith.constant 0 : i32
    return %c0_i32, %c0_i32_0 : i32, i32
  }
  func.func @transform_4(%arg0: i32) -> (i32, i32) {
    %c0_i32 = arith.constant 0 : i32
    %c0_i32_0 = arith.constant 0 : i32
    %c0_i32_1 = arith.constant 0 : i32
    return %c0_i32, %c0_i32_0 : i32, i32
  }
  func.func @transform_5(%arg0: i32) -> (i32, i32) {
    %c0_i32 = arith.constant 0 : i32
    %c0_i32_0 = arith.constant 0 : i32
    %c0_i32_1 = arith.constant 0 : i32
    return %c0_i32, %c0_i32_0 : i32, i32
  }
  func.func @transform_6(%arg0: i32) -> (i32, i32) {
    %c0_i32 = arith.constant 0 : i32
    %c0_i32_0 = arith.constant 0 : i32
    %c0_i32_1 = arith.constant 0 : i32
    return %c0_i32, %c0_i32_0 : i32, i32
  }
  func.func @transform_7(%arg0: i32) -> (i32, i32) {
    %c0_i32 = arith.constant 0 : i32
    %c0_i32_0 = arith.constant 0 : i32
    return %arg0, %c0_i32 : i32, i32
  }
}

</mosaic_0001>

<bundles_post_ra>
// kernel: tpu_custom_call.1
= control target key start
LH: loop header
LB: loop body
LE: loop exit
PB: predicated region body
PF: predicated region fallthrough
CT: control target
= control target key end

     0   :  { %12 = vsyncpa [#allocation3], 0  ;;  %s1036_s0 = inlined_call_operand.hbm [shape: f32[2,256], index: 0, kind: input, shape index: {}]   ;;  %s1037_s1 = inlined_call_operand.hbm [shape: bf16[256,128], index: 1, kind: input, shape index: {}]   ;;  %s1038_s2 = inlined_call_operand.vmem [shape: f32[1,128], index: 2, kind: input, shape index: {}]   ;;  %s1039_s3 = inlined_call_operand.hbm [shape: bf16[128,128], index: 3, kind: input, shape index: {}]   ;;  %s1040_s4 = inlined_call_operand.hbm [shape: f32[1,128], index: 4, kind: input, shape index: {}]   ;;  %s1041_s5 = inlined_call_operand.hbm [shape: bf16[128,256], index: 5, kind: input, shape index: {}]   ;;  %s1042_s6 = inlined_call_operand.vmem [shape: f32[1,256], index: 6, kind: input, shape index: {}]   ;;  %s1043_s7 = inlined_call_operand.hbm [shape: f32[2,256], index: 7, kind: output, shape index: {}]  }
   0x1   :  { %13 = vsyncpa [#allocation6], 0 }
   0x2   :  { %14 = vsyncpa [#allocation9], 0 }
   0x3   :  { %15 = vsyncpa [#allocation4], 0 }
   0x4   :  { %19 = vsyncadd [#allocation3], 192  ;;  %s33_s26 = sshll.u32 %s1037_s1, 4  ;;  %s950_s27 = smov [#allocation5]   ;;  %s34_s26 = int_to_ptr.hbm [resolvable:$true] %s33_s26 }
   0x5   :  { %s35_s28 = sshll.u32 %s950_s27, 4  ;;  %s62_s8 = sshll.u32 %s1040_s4, 4  ;;  %s36_s28 = int_to_ptr.vmem [resolvable:$true] %s35_s28  ;;  %s63_s8 = int_to_ptr.hbm [resolvable:$true] %s62_s8 }
   0x6   :  { %s951_s9 = smov 64   ;;  %s952_s10 = smov 4  }
   0x7   :  { %41 = dma.hbm_to_vmem [thread:$0]  %s34_s26, 2048, %s36_s28, [#allocation6], %s951_s9, %s951_s9, %s952_s10  }
   0x8   :  { %s953_s11 = smov [#allocation8]   ;;  %s20_s1 = sshll.u32 %s1036_s0, 4  ;;  %s21_s1 = int_to_ptr.hbm [resolvable:$true] %s20_s1 }
   0x9   :  { %s64_s12 = sshll.u32 %s953_s11, 4  ;;  %s48_s4 = sshll.u32 %s1039_s3, 4  ;;  %s65_s12 = int_to_ptr.vmem [resolvable:$true] %s64_s12  ;;  %s49_s4 = int_to_ptr.hbm [resolvable:$true] %s48_s4 }
   0xa   :  { %67 = dma.hbm_to_vmem [thread:$0]  %s63_s8, 16, %s65_s12, [#allocation9]  }
   0xb   :  { %s954_s17 = smov [#allocation2]   ;;  %s955_s19 = smov [#allocation7]  }
   0xc   :  { %s22_s18 = sshll.u32 %s954_s17, 4  ;;  %s50_s20 = sshll.u32 %s955_s19, 4  ;;  %s23_s18 = int_to_ptr.vmem [resolvable:$true] %s22_s18  ;;  %s51_s20 = int_to_ptr.vmem [resolvable:$true] %s50_s20 }
   0xd   :  { %28 = dma.hbm_to_vmem [thread:$0]  %s21_s1, 64, %s23_s18, [#allocation3], %s951_s9, %s951_s9, %s952_s10  }
   0xe   :  { %s72_s0 = sshll.u32 %s1041_s5, 4  ;;  %s956_s3 = smov [#allocation10]   ;;  %s73_s0 = int_to_ptr.hbm [resolvable:$true] %s72_s0 }
   0xf   :  { %56 = dma.hbm_to_vmem [thread:$0]  %s49_s4, 1024, %s51_s20, [#allocation6], %s951_s9, %s951_s9, %s952_s10  }
  0x10   :  { %s74_s23 = sshll.u32 %s956_s3, 4  ;;  %s957_s24 = smov 128   ;;  %s75_s23 = int_to_ptr.vmem [resolvable:$true] %s74_s23 }
  0x11   :  { %s958_s25 = smov 8  }
  0x12   :  { %80 = dma.hbm_to_vmem [thread:$0]  %s73_s0, 2048, %s75_s23, [#allocation9], %s957_s24, %s957_s24, %s958_s25  }
  0x13   :  { %942 = dma.done.wait [#allocation3], 256  }
  0x14   :  { %943 = vsyncadd [#allocation3], 4294967040 }
  0x15   :  { %944 = dma.done.wait [#allocation6], 3072  }
  0x16   :  { %945 = vsyncadd [#allocation6], 4294964224 }
  0x17   :  { %946 = dma.done.wait [#allocation9], 2064  }
  0x18   :  { %947 = vsyncadd [#allocation9], 4294965232  ;;  %v745_v0 = vld [vmem:[#allocation5 + $0x38] sm:$0xff]  ;;  %v744_v2 = vld [vmem:[#allocation5 + $0x30] sm:$0xff]  ;;  %vm536_vm6 = vcmask 1041408   ;;  %vm538_vm8 = vcmask 1043458  }
  0x19   :  { %v753_v1 = vld [vmem:[#allocation5 + $0x78] sm:$0xff]  ;;  %256 = vmatpush.bf16.msra.mxu0 %v745_v0  ;;  %v752_v3 = vld [vmem:[#allocation5 + $0x70] sm:$0xff]  ;;  %v743_v4 = vld [vmem:[#allocation5 + $0x28] sm:$0xff]  ;;  %vm541_vm9 = vcmask 1045508   ;;  %vm544_vm10 = vcmask 1045504  }
  0x1a   :  { %269 = vmatpush.bf16.msra.mxu1 %v753_v1  ;;  %v751_v5 = vld [vmem:[#allocation5 + $0x68] sm:$0xff]  ;;  %v103_v6 = vld [vmem:[#allocation2] sm:$0xf]  ;;  %v104_v7 = vld [vmem:[#allocation2 + $0x4] sm:$0xf] }
  0x1b   :  { %v105_v8 = vld [vmem:[#allocation2 + $0x8] sm:$0xf]  ;;  %v106_v9 = vld [vmem:[#allocation2 + $0xc] sm:$0xf]  ;;  %111 = vst [vmem:[#allocation1] ss:$4 sm:$0xff] %v103_v6 }
  0x1c   :  { %113 = vst [vmem:[#allocation1 + $0x1] ss:$4 sm:$0xff] %v104_v7  ;;  %v761_v10 = vld [vmem:[#allocation7 + $0x38] sm:$0xff]  ;;  %v760_v11 = vld [vmem:[#allocation7 + $0x30] sm:$0xff]  ;;  %v742_v12 = vld [vmem:[#allocation5 + $0x20] sm:$0xff] }
  0x1d   :  { %257 = vmatpush.bf16.msra.mxu0 %v744_v2  ;;  %115 = vst [vmem:[#allocation1 + $0x2] ss:$4 sm:$0xff] %v105_v8  ;;  %352 = vmatpush.bf16.msra.mxu2 %v761_v10  ;;  %v750_v13 = vld [vmem:[#allocation5 + $0x60] sm:$0xff]  ;;  %v759_v14 = vld [vmem:[#allocation7 + $0x28] sm:$0xff]  ;;  %v741_v15 = vld [vmem:[#allocation5 + $0x18] sm:$0xff] }
  0x1e   :  { %270 = vmatpush.bf16.msra.mxu1 %v752_v3  ;;  %117 = vst [vmem:[#allocation1 + $0x3] ss:$4 sm:$0xff] %v106_v9  ;;  %v749_v16 = vld [vmem:[#allocation5 + $0x58] sm:$0xff]  ;;  %v758_v17 = vld [vmem:[#allocation7 + $0x20] sm:$0xff]  ;;  %v740_v18 = vld [vmem:[#allocation5 + $0x10] sm:$0xff] }
  0x1f   :  { %v748_v19 = vld [vmem:[#allocation5 + $0x50] sm:$0xff]  ;;  %v757_v20 = vld [vmem:[#allocation7 + $0x18] sm:$0xff]  ;;  %v739_v21 = vld [vmem:[#allocation5 + $0x8] sm:$0xff] }
  0x20   :  { %v747_v22 = vld [vmem:[#allocation5 + $0x48] sm:$0xff]  ;;  %v738_v23 = vld [vmem:[#allocation5] sm:$0xff]  ;;  %v756_v25 = vld [vmem:[#allocation7 + $0x10] sm:$0xff] }
  0x21   :  { %258 = vmatpush.bf16.msra.mxu0 %v743_v4  ;;  %353 = vmatpush.bf16.msra.mxu2 %v760_v11  ;;  %v746_v24 = vld [vmem:[#allocation5 + $0x40] sm:$0xff]  ;;  %v755_v30 = vld [vmem:[#allocation7 + $0x8] sm:$0xff]  ;;  %v730_v32 = vld [vmem:[#allocation10 + $0x70] sm:$0xf] }
  0x22   :  { %271 = vmatpush.bf16.msra.mxu1 %v751_v5  ;;  %v754_v31 = vld [vmem:[#allocation7] sm:$0xff]  ;;  %v777_v33 = vld [vmem:[#allocation10 + $0x74] sm:$0xf0]  ;;  %v776_v34 = vld [vmem:[#allocation10 + $0x74] sm:$0xf] }
  0x23   :  { %v731_v35 = vor.u32 %v777_v33, %v730_v32  ;;  %v732_v36 = vld [vmem:[#allocation10 + $0x78] sm:$0xf0]  ;;  %v722_v37 = vld [vmem:[#allocation10 + $0x60] sm:$0xf]  ;;  %v775_v38 = vld [vmem:[#allocation10 + $0x64] sm:$0xf0] }
  0x24   :  { %v735_v39 = vor.u32 %v776_v34, %v732_v36  ;;  %v774_v40 = vld [vmem:[#allocation10 + $0x64] sm:$0xf]  ;;  %v724_v41 = vld [vmem:[#allocation10 + $0x68] sm:$0xf0]  ;;  %v723_v42 = vor.u32 %v775_v38, %v722_v37  ;;  %v714_v44 = vld [vmem:[#allocation10 + $0x50] sm:$0xf] }
  0x25   :  { %259 = vmatpush.bf16.msra.mxu0 %v742_v12  ;;  %354 = vmatpush.bf16.msra.mxu2 %v759_v14  ;;  %v118_v26 = vld.sshfl [vmem:[#allocation1] sm:$0xff pattern:$0x73625140]  ;;  %v119_v27 = vld.sshfl [vmem:[#allocation1 + $0x8] sm:$0xff pattern:$0x73625140]  ;;  %v727_v43 = vor.u32 %v774_v40, %v724_v41 }
  0x26   :  { %272 = vmatpush.bf16.msra.mxu1 %v750_v13  ;;  %v122_v28 = vpack.c.bf16 %v118_v26, %v118_v26  ;;  %v123_v29 = vpack.c.bf16 %v119_v27, %v119_v27  ;;  %469 = vmatpush.bf16.msra.mxu3 %v731_v35  ;;  %v773_v45 = vld [vmem:[#allocation10 + $0x54] sm:$0xf0]  ;;  %v772_v46 = vld [vmem:[#allocation10 + $0x54] sm:$0xf]  ;;  %v716_v47 = vld [vmem:[#allocation10 + $0x58] sm:$0xf0] }
  0x27   :  { %v715_v48 = vor.u32 %v773_v45, %v714_v44  ;;  %v719_v49 = vor.u32 %v772_v46, %v716_v47  ;;  %v706_v50 = vld [vmem:[#allocation10 + $0x40] sm:$0xf]  ;;  %v771_v51 = vld [vmem:[#allocation10 + $0x44] sm:$0xf0]  ;;  %v770_v52 = vld [vmem:[#allocation10 + $0x44] sm:$0xf] }
  0x28   :  { %v708_v53 = vld [vmem:[#allocation10 + $0x48] sm:$0xf0]  ;;  %v707_v54 = vor.u32 %v771_v51, %v706_v50  ;;  %v698_v56 = vld [vmem:[#allocation10 + $0x30] sm:$0xf]  ;;  %v769_v57 = vld [vmem:[#allocation10 + $0x34] sm:$0xf0] }
  0x29   :  { %260 = vmatpush.bf16.msra.mxu0 %v741_v15  ;;  %355 = vmatpush.bf16.msra.mxu2 %v758_v17  ;;  %v711_v55 = vor.u32 %v770_v52, %v708_v53  ;;  %v768_v58 = vld [vmem:[#allocation10 + $0x34] sm:$0xf]  ;;  %v700_v59 = vld [vmem:[#allocation10 + $0x38] sm:$0xf0]  ;;  %v699_v60 = vor.u32 %v769_v57, %v698_v56  ;;  %v690_v62 = vld [vmem:[#allocation10 + $0x20] sm:$0xf] }
  0x2a   :  { %273 = vmatpush.bf16.msra.mxu1 %v749_v16  ;;  %470 = vmatpush.bf16.msra.mxu3 %v723_v42  ;;  %v703_v61 = vor.u32 %v768_v58, %v700_v59  ;;  %v767_v63 = vld [vmem:[#allocation10 + $0x24] sm:$0xf0]  ;;  %v766_v0 = vld [vmem:[#allocation10 + $0x24] sm:$0xf]  ;;  %v692_v1 = vld [vmem:[#allocation10 + $0x28] sm:$0xf0] }
  0x2b   :  { %v691_v2 = vor.u32 %v767_v63, %v690_v62  ;;  %v788_v3 = vld [vmem:[%s1038_s2] ss:$0 sm:$0xff]  ;;  %v695_v4 = vor.u32 %v766_v0, %v692_v1  ;;  %v682_v13 = vld [vmem:[#allocation10 + $0x10] sm:$0xf]  ;;  %v765_v14 = vld [vmem:[#allocation10 + $0x14] sm:$0xf0] }
  0x2c   :  { %v764_v15 = vld [vmem:[#allocation10 + $0x14] sm:$0xf]  ;;  %v683_v16 = vor.u32 %v765_v14, %v682_v13  ;;  %v684_v17 = vld [vmem:[#allocation10 + $0x18] sm:$0xf0] }
  0x2d   :  { %261 = vmatpush.bf16.msra.mxu0 %v740_v18  ;;  %356 = vmatpush.bf16.msra.mxu2 %v757_v20  ;;  %v687_v18 = vor.u32 %v764_v15, %v684_v17  ;;  %v763_v20 = vld [vmem:[#allocation10 + $0x4] sm:$0xf0] }
  0x2e   :  { %274 = vmatpush.bf16.msra.mxu1 %v748_v19  ;;  %471 = vmatpush.bf16.msra.mxu3 %v715_v48  ;;  %v674_v19 = vld [vmem:[#allocation10] sm:$0xf] }
  0x31   :  { %262 = vmatpush.bf16.msra.mxu0 %v739_v21  ;;  %357 = vmatpush.bf16.msra.mxu2 %v756_v25  ;;  %v762_v21 = vld [vmem:[#allocation10 + $0x4] sm:$0xf]  ;;  %v789_v25 = vld [vmem:[#allocation8] ss:$0 sm:$0xff] }
  0x32   :  { %275 = vmatpush.bf16.msra.mxu1 %v747_v22  ;;  %472 = vmatpush.bf16.msra.mxu3 %v707_v54  ;;  %v675_v22 = vor.u32 %v763_v20, %v674_v19 }
  0x35   :  { %263 = vmatpush.bf16.msra.mxu0 %v738_v23  ;;  %358 = vmatpush.bf16.msra.mxu2 %v755_v30  ;;  %v676_v23 = vld [vmem:[#allocation10 + $0x8] sm:$0xf0] }
  0x36   :  { %276 = vmatpush.bf16.msra.mxu1 %v746_v24  ;;  %473 = vmatpush.bf16.msra.mxu3 %v699_v60  ;;  %v679_v24 = vor.u32 %v762_v21, %v676_v23 }
  0x38   :  { %264 = vmatmul.bf16.vlgmr.msra.gmra.mxu0 %v122_v28 }
  0x39   :  { %277 = vmatmul.bf16.vlgmr.msra.gmra.mxu1 %v123_v29  ;;  %359 = vmatpush.bf16.msra.mxu2 %v754_v31  ;;  %v383_v31 = vld [vmem:[%s1042_s6] sm:$0x3] }
  0x3a   :  { %482 = vmatpush.bf16.msrb.mxu0 %v735_v39  ;;  %474 = vmatpush.bf16.msra.mxu3 %v691_v2  ;;  %v386_v32 = vperm.slane %v383_v31, 1  ;;  %v385_v36 = vperm.slane %v383_v31, 0 }
  0x3e   :  { %483 = vmatpush.bf16.msrb.mxu0 %v727_v43  ;;  %475 = vmatpush.bf16.msra.mxu3 %v683_v16 }
  0x42   :  { %484 = vmatpush.bf16.msrb.mxu0 %v719_v49  ;;  %476 = vmatpush.bf16.msra.mxu3 %v675_v22 }
  0x46   :  { %485 = vmatpush.bf16.msrb.mxu0 %v711_v55 }
  0x4a   :  { %486 = vmatpush.bf16.msrb.mxu0 %v703_v61 }
  0x4e   :  { %487 = vmatpush.bf16.msrb.mxu0 %v695_v4 }
  0x52   :  { %488 = vmatpush.bf16.msrb.mxu0 %v687_v18 }
  0x56   :  { %489 = vmatpush.bf16.msrb.mxu0 %v679_v24 }
  0xb5   :  { %v265_v5 = vpop.f32.mrf.mxu0 }
  0xb6   :  { %v278_v6 = vpop.f32.mrf.mxu1  ;;  %v266_v7 = vadd.f32 %v788_v3, %v265_v5 }
  0xb8   :  { %v279_v8 = vadd.f32 %v278_v6, %v266_v7 }
  0xba   :  { %v282_v9 = vmax.f32 %v279_v8, 0.0 }
  0xbc   :  { %v283_v10 = vpack.c.bf16 %v282_v9, %v282_v9 }
  0xbd   :  { %v267_v11 = vpop.f32.mrf.mxu0 }
  0xbe   :  { %v280_v12 = vpop.f32.mrf.mxu1  ;;  %360 = vmatmul.bf16.vlgmr.msra.gmra.mxu2 %v283_v10 }
 0x141   :  { %v361_v26 = vpop.f32.mrf.mxu2 }
 0x142   :  { %v362_v27 = vadd.f32 %v789_v25, %v361_v26 }
 0x144   :  { %v365_v28 = vmax.f32 %v362_v27, 0.0 }
 0x146   :  { %v366_v29 = vpack.c.bf16 %v365_v28, %v365_v28 }
 0x148   :  { %477 = vmatmul.bf16.vlgmr.msra.gmra.mxu3 %v366_v29  ;;  %490 = vmatmul.bf16.vlgmr.msrb.gmra.mxu0 %v366_v29 }
 0x149   :  { %v363_v30 = vpop.f32.mrf.mxu2 }
 0x1c5   :  { %v491_v33 = vpop.f32.mrf.mxu0 }
 0x1c6   :  { %v492_v34 = vadd.f32 %v491_v33, %v386_v32 }
 0x1c8   :  { %v737_v35 = vmul.f32 -1.442695, %v492_v34 }
 0x1ca   :  { %790 = vpow2.f32 %v737_v35 }
 0x1cb   :  { %v478_v37 = vpop.f32.mrf.mxu3 }
 0x1cc   :  { %v479_v38 = vadd.f32 %v478_v37, %v385_v36 }
 0x1cd   :  { %v493_v39 = vpop.f32.mrf.mxu0 }
 0x1ce   :  { %v736_v40 = vmul.f32 -1.442695, %v479_v38 }
 0x1d0   :  { %v791_v41 = vpop.eup %790  ;;  %792 = vpow2.f32 %v736_v40 }
 0x1d1   :  { %v502_v42 = vadd.f32 1.0, %v791_v41 }
 0x1d3   :  { %794 = vrcp.f32 %v502_v42  ;;  %v480_v43 = vpop.f32.mrf.mxu3  ;;  %v529_v51 = vand.u32 2147483648, %v502_v42  ;;  %vm523_vm1 = vweird.f32 %v502_v42  ;;  %v527_v53 = vand.u32 2147483647, %v502_v42 }
 0x1d5   :  { %v530_v57 = vor.u32 1.1754944e-38, %v529_v51  ;;  %vm528_vm3 = vcmp.eq.f32.partialorder %v527_v53, 8.507059e+37 }
 0x1d6   :  { %v793_v44 = vpop.eup %792 }
 0x1d7   :  { %v501_v45 = vadd.f32 1.0, %v793_v44 }
 0x1d9   :  { %v795_v46 = vpop.eup %794  ;;  %796 = vrcp.f32 %v501_v45  ;;  %v514_v58 = vand.u32 2147483648, %v501_v45  ;;  %v512_v60 = vand.u32 2147483647, %v501_v45  ;;  %vm508_vm5 = vweird.f32 %v501_v45 }
 0x1da   :  { %v519_v47 = vmul.f32 %v795_v46, %v502_v42  ;;  %vm524_vm0 = vweird.f32 %v795_v46 }
 0x1db   :  { %vm525_vm2 = vmor %vm523_vm1, %vm524_vm0  ;;  %v515_v63 = vor.u32 1.1754944e-38, %v514_v58  ;;  %vm513_vm11 = vcmp.eq.f32.partialorder %v512_v60, 8.507059e+37 }
 0x1dc   :  { %v520_v48 = vsub.f32 1.0, %v519_v47 }
 0x1de   :  { %v521_v49 = vmul.f32 %v795_v46, %v520_v48 }
 0x1df   :  { %v797_v50 = vpop.eup %796 }
 0x1e0   :  { %v522_v52 = vadd.f32 %v795_v46, %v521_v49  ;;  %v504_v54 = vmul.f32 %v797_v50, %v501_v45  ;;  %vm509_vm4 = vweird.f32 %v797_v50 }
 0x1e1   :  { %vm510_vm7 = vmor %vm508_vm5, %vm509_vm4 }
 0x1e2   :  { %v526_v55 = vsel %vm525_vm2, %v795_v46, %v522_v52  ;;  %v505_v56 = vsub.f32 1.0, %v504_v54 }
 0x1e3   :  { %v531_v61 = vsel %vm528_vm3, %v530_v57, %v526_v55 }
 0x1e4   :  { %v506_v59 = vmul.f32 %v797_v50, %v505_v56  ;;  %v535_v0 = vrot.slane %v531_v61, 6 }
 0x1e6   :  { %v507_v62 = vadd.f32 %v797_v50, %v506_v59 }
 0x1e8   :  { %v511_v1 = vsel %vm510_vm7, %v797_v50, %v507_v62 }
 0x1e9   :  { %v516_v2 = vsel %vm513_vm11, %v515_v63, %v511_v1 }
 0x1ea   :  { %v537_v3 = vsel %vm536_vm6, %v516_v2, %v535_v0  ;;  %v539_v4 = vsel %vm538_vm8, %v516_v2, %v535_v0  ;;  %v542_v5 = vsel %vm541_vm9, %v516_v2, %v535_v0  ;;  %v545_v6 = vsel %vm544_vm10, %v535_v0, %v516_v2 }
 0x1eb   :  { %v540_v7 = vrot.slane %v539_v4, 2  ;;  %v543_v8 = vrot.slane %v542_v5, 4  ;;  %v546_v9 = vrot.slane %v545_v6, 6  ;;  %551 = vst [vmem:[#allocation11] sm:$0xf] %v537_v3 }
 0x1ed   :  { %552 = vst [vmem:[#allocation11 + $0x4] sm:$0xf] %v540_v7 }
 0x1ee   :  { %553 = vst [vmem:[#allocation11 + $0x8] sm:$0xf] %v543_v8 }
 0x1ef   :  { %554 = vst [vmem:[#allocation11 + $0xc] sm:$0xf] %v546_v9 }
 0x1f0   :  { %558 = vsyncadd [#allocation4], 192  ;;  %s561_s29 = sshll.u32 %s1043_s7, 4  ;;  %s959_s30 = smov [#allocation11]   ;;  %s562_s29 = int_to_ptr.hbm [resolvable:$true] %s561_s29 }
 0x1f1   :  { %s559_s8 = sshll.u32 %s959_s30, 4  ;;  %s560_s8 = int_to_ptr.vmem [resolvable:$true] %s559_s8 }
 0x1f2   :  { %567 = dma.vmem_to_hbm [thread:$0]  %s560_s8, 64, %s562_s29, [#allocation4], %s951_s9, %s951_s9, %s952_s10  }
 0x1f3   :  { %948 = dma.done.wait [#allocation4], 256  }
 0x1f4   :  { %949 = vsyncadd [#allocation4], 4294967040 }
 0x1f5   :  { %572 = vsyncpa [#allocation3], 1 }
 0x1f6   :  { %573 = vsyncpa [#allocation6], 1 }
 0x1f7   :  { %574 = vsyncpa [#allocation9], 1 }
 0x1f8   :  { %575 = vsyncpa [#allocation4], 1 }

</bundles_post_ra>
